<compile_context>
chip_gen: v7x
topology: tpu7x:2x2x1
jax: 0.10.0
libtpu: 0.0.40
codegen_flags: <defaults>
</compile_context>

<pallas_src>
import functools

import numpy as np
import jax
import jax.numpy as jnp
from jax.experimental import pallas as pl
from jax.experimental.pallas import tpu as pltpu


_VMEM_TEMP_BUDGET = 1 << 20    # ~1 MiB of padded-f32 footprint per block-sized temporary
_FLAT_PLANE_LIMIT = 2 << 20    # only flatten planes while one plane group stays small


def _round_up(n, m):
    return (n + m - 1) // m * m


def _largest_divisor_leq(n, cap):
    cap = max(1, min(n, cap))
    for d in range(cap, 0, -1):
        if n % d == 0:
            return d
    return 1


def _tv_kernel_flat(x_ref, wmask_ref, o_ref, *, H, W):
    """Block = (1, TBC, H*W): one plane per sublane-row, lane-dense last dim."""
    HW = H * W
    x = x_ref[0].astype(jnp.float32)                  # (TBC, H*W)
    # vertical neighbours: flattened offset +W never crosses a plane boundary
    dh = x[:, W:] - x[:, : HW - W]
    o_ref[0, 0] = jnp.sum(dh * dh)
    # horizontal neighbours: offset +1; wmask zeroes the (w == W-1) wrap positions
    dw = x[:, 1:] - x[:, : HW - 1]
    o_ref[0, 1] = jnp.sum(dw * dw * wmask_ref[:, : HW - 1])


def _tv_kernel_3d(x_ref, o_ref):
    """Block = (TBC, H, W): used when W is already lane-aligned (>= 128)."""
    x = x_ref[...].astype(jnp.float32)                # (TBC, H, W)
    dh = x[:, 1:, :] - x[:, :-1, :]
    o_ref[0, 0] = jnp.sum(dh * dh)
    dw = x[:, :, 1:] - x[:, :, :-1]
    o_ref[0, 1] = jnp.sum(dw * dw)


def tv_loss(x, tv_weight=1.0, *, block_planes=None):
    """Pallas TPU implementation of TVLoss.forward for NCHW input."""
    B, C, H, W = x.shape
    if H < 2 or W < 2:
        # TODO(synk): H==1 / W==1 makes count_h/count_w zero in the reference
        # module (nan/inf result); not supported here (zero-sized diffs).
        raise NotImplementedError("tv_loss requires H >= 2 and W >= 2")

    N = B * C
    HW = H * W

    hw_row_bytes = _round_up(HW, 128) * 4             # one flattened plane row, padded, f32
    use_flat = (W < 128) and (8 * hw_row_bytes <= _FLAT_PLANE_LIMIT)

    if use_flat:
        # cap = planes per block such that round_up(TBC,8) * hw_row_bytes <= budget
        cap = 8 * max(1, _VMEM_TEMP_BUDGET // (8 * hw_row_bytes))
    else:
        # TODO(synk): very large single planes (multi-MiB) are not intra-plane tiled.
        plane_pad_bytes = _round_up(H, 8) * _round_up(W, 128) * 4
        cap = max(1, _VMEM_TEMP_BUDGET // plane_pad_bytes)

    if block_planes is None:
        tbc = _largest_divisor_leq(N, cap)            # divides N -> no padding needed
    else:
        tbc = max(1, min(int(block_planes), N))
    num_blocks = (N + tbc - 1) // tbc
    n_pad = num_blocks * tbc

    compiler_params = pltpu.CompilerParams(
        dimension_semantics=("parallel",),            # independent per-block partials
        vmem_limit_bytes=32 * 1024 * 1024,
    )
    out_shape = jax.ShapeDtypeStruct((num_blocks, 2), jnp.float32)
    out_spec = pl.BlockSpec((1, 2), lambda i: (i, 0), memory_space=pltpu.SMEM)

    if use_flat:
        xr = x.reshape(N, HW)
        if n_pad != N:
            xr = jnp.pad(xr, ((0, n_pad - N), (0, 0)))    # zero planes add 0 to both sums
        xr = xr.reshape(num_blocks, tbc, HW)
        # per-lane weight zeroing the row-wrap positions of the +1 (horizontal) diff
        wmask = jnp.asarray(
            (np.arange(HW) % W != (W - 1)).astype(np.float32)
        ).reshape(1, HW)
        partials = pl.pallas_call(
            functools.partial(_tv_kernel_flat, H=H, W=W),
            out_shape=out_shape,
            grid=(num_blocks,),
            in_specs=[
                pl.BlockSpec((1, tbc, HW), lambda i: (i, 0, 0)),
                pl.BlockSpec((1, HW), lambda i: (0, 0)),  # resident, not re-fetched per step
            ],
            out_specs=out_spec,
            compiler_params=compiler_params,
        )(xr, wmask)
    else:
        xr = x.reshape(N, H, W)
        if n_pad != N:
            xr = jnp.pad(xr, ((0, n_pad - N), (0, 0), (0, 0)))
        partials = pl.pallas_call(
            _tv_kernel_3d,
            out_shape=out_shape,
            grid=(num_blocks,),
            in_specs=[pl.BlockSpec((tbc, H, W), lambda i: (i, 0, 0))],
            out_specs=out_spec,
            compiler_params=compiler_params,
        )(xr)

    h_tv = jnp.sum(partials[:, 0])
    w_tv = jnp.sum(partials[:, 1])
    count_h = C * (H - 1) * W
    count_w = C * H * (W - 1)
    return tv_weight * 2.0 * (h_tv / count_h + w_tv / count_w) / B


def tv_loss_ref(x, tv_weight=1.0):
    """Pure-JAX reference matching the PyTorch module."""
    B, C, H, W = x.shape
    count_h = C * (H - 1) * W
    count_w = C * H * (W - 1)
    h_tv = jnp.sum((x[:, :, 1:, :] - x[:, :, : H - 1, :]) ** 2)
    w_tv = jnp.sum((x[:, :, :, 1:] - x[:, :, :, : W - 1]) ** 2)
    return tv_weight * 2.0 * (h_tv / count_h + w_tv / count_w) / B


if __name__ == "__main__":
    key0, key1 = jax.random.split(jax.random.PRNGKey(0), 2)

    # main test shape (flat / lane-dense path, single block)
    x = jax.random.normal(key0, (2, 4, 16, 16), dtype=jnp.float32)
    out = jax.block_until_ready(tv_loss(x, tv_weight=1.0))
    ref = jax.block_until_ready(tv_loss_ref(x, tv_weight=1.0))
    assert jnp.allclose(out, ref, rtol=1e-5, atol=1e-5), (out, ref)

    # multi-block + zero-padding path (forced small block count per step)
    out2 = jax.block_until_ready(tv_loss(x, tv_weight=0.5, block_planes=3))
    ref2 = jax.block_until_ready(tv_loss_ref(x, tv_weight=0.5))
    assert jnp.allclose(out2, ref2, rtol=1e-5, atol=1e-5), (out2, ref2)

    # lane-aligned (W >= 128) 3-D path
    xw = jax.random.normal(key1, (1, 2, 8, 128), dtype=jnp.float32)
    out3 = jax.block_until_ready(tv_loss(xw, tv_weight=1.0))
    ref3 = jax.block_until_ready(tv_loss_ref(xw, tv_weight=1.0))
    assert jnp.allclose(out3, ref3, rtol=1e-5, atol=1e-5), (out3, ref3)

    print("KERNEL_OK")
</pallas_src>

<mosaic_0001>
module attributes {stable_mosaic.version = 11 : i64} {
  func.func @_tv_kernel_flat(%arg0: i32, %arg1: memref<1x8x256xf32, #tpu.memory_space<vmem>>, %arg2: memref<1x256xf32, #tpu.memory_space<vmem>>, %arg3: memref<1x2xf32, #tpu.memory_space<smem>>) attributes {dimension_semantics = [#tpu.dimension_semantics<parallel>], iteration_bounds = array<i64: 1>, scalar_prefetch = 0 : i64, scratch_operands = 0 : i64, tpu.core_type = #tpu.core_type<tc>, window_params = [{transform_indices = @transform_0, window_bounds = array<i64: 1, 8, 256>}, {pipeline_mode = #tpu.pipeline_mode<synchronous>, transform_indices = @transform_1, window_bounds = array<i64: 1, 256>}, {transform_indices = @transform_2, window_bounds = array<i64: 1, 2>}]} {
    %c0 = arith.constant 0 : index
    %c0_0 = arith.constant 0 : index
    %c0_1 = arith.constant 0 : index
    %0 = vector.load %arg1[%c0, %c0_0, %c0_1] : memref<1x8x256xf32, #tpu.memory_space<vmem>>, vector<1x8x256xf32>
    %1 = vector.shape_cast %0 : vector<1x8x256xf32> to vector<8x256xf32>
    %2 = vector.extract_strided_slice %1 {offsets = [0, 16], sizes = [8, 240], strides = [1, 1]} : vector<8x256xf32> to vector<8x240xf32>
    %3 = vector.extract_strided_slice %1 {offsets = [0, 0], sizes = [8, 240], strides = [1, 1]} : vector<8x256xf32> to vector<8x240xf32>
    %4 = arith.subf %2, %3 : vector<8x240xf32>
    %5 = arith.mulf %4, %4 : vector<8x240xf32>
    %6 = vector.shape_cast %5 : vector<8x240xf32> to vector<1x8x240xf32>
    %cst = arith.constant dense<0.000000e+00> : vector<1xf32>
    %7 = vector.multi_reduction <add>, %6, %cst [1, 2] : vector<1x8x240xf32> to vector<1xf32>
    %8 = vector.shape_cast %7 : vector<1xf32> to vector<1x1x1xf32>
    %9 = vector.extract %8[0, 0, 0] : f32 from vector<1x1x1xf32>
    %c0_2 = arith.constant 0 : index
    %c0_3 = arith.constant 0 : index
    %10 = memref.load %arg3[%c0_2, %c0_3] : memref<1x2xf32, #tpu.memory_space<smem>>
    memref.store %9, %arg3[%c0_2, %c0_3] : memref<1x2xf32, #tpu.memory_space<smem>>
    %11 = vector.extract_strided_slice %1 {offsets = [0, 1], sizes = [8, 255], strides = [1, 1]} : vector<8x256xf32> to vector<8x255xf32>
    %12 = vector.extract_strided_slice %1 {offsets = [0, 0], sizes = [8, 255], strides = [1, 1]} : vector<8x256xf32> to vector<8x255xf32>
    %13 = arith.subf %11, %12 : vector<8x255xf32>
    %14 = arith.mulf %13, %13 : vector<8x255xf32>
    %c0_4 = arith.constant 0 : index
    %c0_5 = arith.constant 0 : index
    %15 = vector.load %arg2[%c0_4, %c0_5] : memref<1x256xf32, #tpu.memory_space<vmem>>, vector<1x255xf32>
    %16 = vector.broadcast %15 : vector<1x255xf32> to vector<8x255xf32>
    %17 = arith.mulf %14, %16 : vector<8x255xf32>
    %18 = vector.shape_cast %17 : vector<8x255xf32> to vector<1x8x255xf32>
    %cst_6 = arith.constant dense<0.000000e+00> : vector<1xf32>
    %19 = vector.multi_reduction <add>, %18, %cst_6 [1, 2] : vector<1x8x255xf32> to vector<1xf32>
    %20 = vector.shape_cast %19 : vector<1xf32> to vector<1x1x1xf32>
    %21 = vector.extract %20[0, 0, 0] : f32 from vector<1x1x1xf32>
    %c0_7 = arith.constant 0 : index
    %c1 = arith.constant 1 : index
    %22 = memref.load %arg3[%c0_7, %c1] : memref<1x2xf32, #tpu.memory_space<smem>>
    memref.store %21, %arg3[%c0_7, %c1] : memref<1x2xf32, #tpu.memory_space<smem>>
    return
  }
  func.func @transform_0(%arg0: i32) -> (i32, i32, i32) {
    %c0_i32 = arith.constant 0 : i32
    %c0_i32_0 = arith.constant 0 : i32
    %c0_i32_1 = arith.constant 0 : i32
    return %arg0, %c0_i32, %c0_i32_0 : i32, i32, i32
  }
  func.func @transform_1(%arg0: i32) -> (i32, i32) {
    %c0_i32 = arith.constant 0 : i32
    %c0_i32_0 = arith.constant 0 : i32
    %c0_i32_1 = arith.constant 0 : i32
    return %c0_i32, %c0_i32_0 : i32, i32
  }
  func.func @transform_2(%arg0: i32) -> (i32, i32) {
    %c0_i32 = arith.constant 0 : i32
    %c0_i32_0 = arith.constant 0 : i32
    return %arg0, %c0_i32 : i32, i32
  }
}

</mosaic_0001>

<bundles_post_ra>
// kernel: tpu_custom_call.1
= control target key start
LH: loop header
LB: loop body
LE: loop exit
PB: predicated region body
PF: predicated region fallthrough
CT: control target
= control target key end

     0   :  { %7 = vsyncpa [#allocation3], 0  ;;  %s227_s0 = inlined_call_operand.hbm [shape: f32[1,8,256], index: 0, kind: input, shape index: {}]   ;;  %s228_s1 = inlined_call_operand.vmem [shape: f32[1,256], index: 1, kind: input, shape index: {}]   ;;  %s229_s2 = inlined_call_operand.hbm [shape: f32[1,2], index: 2, kind: output, shape index: {}]  }
   0x1   :  { %8 = vsyncpa [#allocation4], 0  ;;  %s177_s9 = smov [#allocation2]   ;;  %s141_s13 = scalar_lea.hbm %s227_s0, 256 }
   0x2   :  { %s15_s10 = sshll.u32 %s177_s9, 4  ;;  %p142_p0 = scmp.ne.s32.totalorder %s227_s0, %s141_s13  ;;  %s16_s10 = int_to_ptr.vmem [resolvable:$true] %s15_s10 }
   0x3   :  { %p145_p1 = scmp.lt.u32.totalorder %s141_s13, %s227_s0 }
   0x5   :  { %p147_p2 = pnand %p145_p1, %p142_p0 }
   0x7   :  { %150 = shalt.err (!%p147_p2)
}
   0x8   :  { %s151_s18 = scalar_lea.vmem %s16_s10, 256  ;;  %p156_p4 = scmp.lt.s32.totalorder %s16_s10, %s16_s10 }
   0x9   :  { %p152_p3 = scmp.ne.s32.totalorder %s16_s10, %s151_s18  ;;  %p157_p5 = scmp.lt.s32.totalorder %s151_s18, %s151_s18 }
   0xb   :  { %p158_p6 = por %p157_p5, %p156_p4 }
   0xd   :  { %p159_p7 = pnand %p158_p6, %p152_p3 }
   0xf   :  { %162 = shalt.err (!%p159_p7)
}
  0x10   :  { %18 = dma.hbm_to_vmem [thread:$0]  %s227_s0, 256, %s16_s10, [#allocation3]  }
  0x11   :  { %173 = dma.done.wait [#allocation3], 256  }
  0x12   :  { %174 = vsyncadd [#allocation3], 4294967040  ;;  %v77_v0 = vlaneseq  ;;  %v24_v2 = vld [vmem:[#allocation2] sm:$0xff]  ;;  %s178_s21 = smov 16   ;;  %s179_s22 = smov 1   ;;  %v25_v5 = vld [vmem:[#allocation2 + $0x8] sm:$0xff] }
  0x13   :  { %28 = vrot.lane.b32.xlu1 %v24_v2, %s178_s21  ;;  %63 = vrot.lane.b32.xlu0 %v24_v2, %s179_s22  ;;  %v75_v6 = vld [vmem:[%s228_s1] sm:$0x3]  ;;  %vm32_vm0 = vcmask 130048   ;;  %vm67_vm1 = vcmask 7168   ;;  %s180_s0 = smov 112   ;;  %s181_s1 = smov 127  }
  0x14   :  { %v78_v1 = vshrl.u32 %v77_v0, 7  ;;  %vm46_vm2 = vcmask 916480   ;;  %vm100_vm3 = vcmask 1039360   ;;  %s163_s29 = scalar_lea.hbm %s229_s2, 16 }
  0x15   :  { %p164_p8 = scmp.ne.s32.totalorder %s229_s2, %s163_s29  ;;  %p167_p9 = scmp.lt.u32.totalorder %s163_s29, %s229_s2 }
  0x16   :  { %v83_v3 = vsub.s32 1, %v78_v1  ;;  %v79_v4 = vsub.s32 0, %v78_v1 }
  0x17   :  { %30 = vrot.lane.b32.xlu1 %v25_v5, %s178_s21  ;;  %65 = vrot.lane.b32.xlu0 %v25_v5, %s179_s22  ;;  %p169_p10 = pnand %p167_p9, %p164_p8 }
  0x18   :  { %v84_v7 = vrot.slane %v75_v6, %v83_v3  ;;  %v80_v8 = vrot.slane %v75_v6, %v79_v4 }
  0x1b   :  { %87 = vrot.lane.b32.xlu1 %v84_v7, %s179_s22  ;;  %85 = vrot.lane.b32.xlu0 %v80_v8, %s179_s22 }
  0x85   :  { %v29_v9 = vpop.permute.xlu1 %28  ;;  %v64_v10 = vpop.permute.xlu0 %63 }
  0x86   :  { %v36_v11 = vsub.f32 %v24_v2, %v29_v9  ;;  %v71_v13 = vsub.f32 %v24_v2, %v64_v10 }
  0x88   :  { %v38_v12 = vmul.f32 %v36_v11, %v36_v11  ;;  %v73_v20 = vmul.f32 %v71_v13, %v71_v13 }
  0x89   :  { %v31_v14 = vpop.permute.xlu1 %30  ;;  %v66_v15 = vpop.permute.xlu0 %65 }
  0x8a   :  { %v33_v16 = vsel %vm32_vm0, %v29_v9, %v31_v14  ;;  %v68_v17 = vsel %vm67_vm1, %v64_v10, %v66_v15  ;;  %42 = vrot.lane.b32.xlu0 %v38_v12, %s180_s0 }
  0x8b   :  { %v37_v18 = vsub.f32 %v25_v5, %v33_v16  ;;  %v72_v19 = vsub.f32 %v25_v5, %v68_v17 }
  0x8d   :  { %v39_v21 = vmul.f32 %v37_v18, %v37_v18  ;;  %v74_v22 = vmul.f32 %v72_v19, %v72_v19  ;;  %v88_v23 = vpop.permute.xlu1 %87  ;;  %v86_v24 = vpop.permute.xlu0 %85 }
  0x8e   :  { %v89_v25 = vsel %vm67_vm1, %v86_v24, %v88_v23  ;;  %v92_v26 = vmul.f32 %v86_v24, %v73_v20 }
  0x8f   :  { %44 = vrot.lane.b32.xlu1 %v39_v21, %s180_s0  ;;  %v93_v27 = vmul.f32 %v89_v25, %v74_v22 }
  0x90   :  { %96 = vrot.lane.b32.xlu0 %v92_v26, %s181_s1 }
  0x93   :  { %98 = vrot.lane.b32.xlu1 %v93_v27, %s181_s1 }
  0xfc   :  { %v43_v28 = vpop.permute.xlu0 %42 }
 0x101   :  { %v45_v29 = vpop.permute.xlu1 %44 }
 0x102   :  { %v47_v30 = vsel %vm46_vm2, %v43_v28, %v45_v29  ;;  %v50_v31 = vsel %vm46_vm2, %v45_v29, 0.0  ;;  %v97_v33 = vpop.permute.xlu0 %96 }
 0x103   :  { %v51_v32 = vadd.f32 %v50_v31, %v47_v30 }
 0x105   :  { %v99_v34 = vpop.permute.xlu1 %98  ;;  %52 = vadd.xlane.f32.xlu0 %v51_v32 }
 0x106   :  { %v101_v35 = vsel %vm100_vm3, %v97_v33, %v99_v34  ;;  %v104_v36 = vsel %vm100_vm3, %v99_v34, 0.0 }
 0x107   :  { %v105_v37 = vadd.f32 %v104_v36, %v101_v35 }
 0x109   :  { %106 = vadd.xlane.f32.xlu1 %v105_v37 }
 0x192   :  { %v53_v38 = vpop.xlane.xlu0 %52 }
 0x193   :  { %v54_v39 = vrot.slane %v53_v38, 4 }
 0x195   :  { %v55_v40 = vadd.f32 %v54_v39, %v53_v38 }
 0x196   :  { %v107_v41 = vpop.xlane.xlu1 %106 }
 0x197   :  { %v56_v42 = vrot.slane %v55_v40, 2  ;;  %v108_v43 = vrot.slane %v107_v41, 4 }
 0x199   :  { %v109_v44 = vadd.f32 %v108_v43, %v107_v41  ;;  %v57_v45 = vadd.f32 %v56_v42, %v55_v40 }
 0x19b   :  { %v110_v46 = vrot.slane %v109_v44, 2  ;;  %v58_v47 = vrot.slane %v57_v45, 1 }
 0x19d   :  { %v111_v48 = vadd.f32 %v110_v46, %v109_v44  ;;  %v59_v49 = vadd.f32 %v58_v47, %v57_v45 }
 0x19f   :  { %131 = vpush %v59_v49  ;;  %v112_v50 = vrot.slane %v111_v48, 1 }
 0x1a1   :  { %v113_v51 = vadd.f32 %v112_v50, %v111_v48 }
 0x1a3   :  { %133 = vpush %v113_v51 }
 0x1d0   :  { %s132_s25 = spop %131 }
 0x1d1   :  { %62 = sst [smem:[#allocation5]] %s132_s25 }
 0x1d4   :  { %s134_s26 = spop %133 }
 0x1d5   :  { %116 = sst [smem:[#allocation5 + $0x1]] %s134_s26 }
 0x1d6   :  { %172 = shalt.err (!%p169_p10)
}
 0x1d7   :  { %s182_s6 = smov [#allocation5]  }
 0x1d8   :  { %124 = dma.smem_to_hbm %s182_s6, 16, %s229_s2, [#allocation4]  }
 0x1d9   :  { %175 = dma.done.wait [#allocation4], 16  }
 0x1da   :  { %176 = vsyncadd [#allocation4], 4294967280 }
 0x1db   :  { %128 = sfence }
 0x1dc   :  { %129 = vsyncpa [#allocation3], 1 }
 0x1dd   :  { %130 = vsyncpa [#allocation4], 1 }

</bundles_post_ra>
